<compile_context>
chip_gen: v7x
topology: tpu7x:2x2x1
jax: 0.10.0
libtpu: 0.0.40
codegen_flags: <defaults>
</compile_context>

<pallas_src>
import math
from functools import partial

import jax
import jax.numpy as jnp
from jax import lax
from jax.experimental import pallas as pl
from jax.experimental.pallas import tpu as pltpu

EMBED_DIM = 256      # fixed by LoRA_Sam.__init__: MultiScaleCrossAttention(256, 8), AdaptiveFeatureFusion(256)
NUM_HEADS = 8
FF_DIM = 4 * EMBED_DIM
LORA_DIM = 64        # small synthetic stand-in for the SAM image-encoder block width
LORA_R = 4           # hardcoded r = 4 inside _init_lora_adapters

VMEM_LIMIT = 32 * 1024 * 1024   # explicit scoped-VMEM cap (safe on v5e/v6e/v7x)


def _sigmoid(x):
    # numerically-stable sigmoid, routed through the EUP tanh unit (exact identity, no overflow).
    return 0.5 * (jnp.tanh(0.5 * x) + 1.0)


# ----------------------------------------------------------------------------- generic linear (bf16 MXU)
def _linear_kernel(x_ref, w_ref, b_ref, o_ref, *, act):
    # layout: x (tile_m, Din) row-major, Din/Dout on lanes; weights already bf16, f32 accumulation.
    # NOTE: a trailing partial M tile reads unspecified rows past N; only row-wise ops happen here and
    #       the garbage rows are dropped on write-back, so this is correct — do NOT add a reduction
    #       over the M axis of this tile.
    x = x_ref[...].astype(jnp.bfloat16)
    y = jnp.dot(x, w_ref[...], preferred_element_type=jnp.float32) + b_ref[...]
    if act == "relu":
        y = jnp.maximum(y, 0.0)
    o_ref[...] = y.astype(o_ref.dtype)


def pallas_linear(x, w_bf16, b, act=None, tile_m=None):
    """y = x @ w + b  (w is the transposed PyTorch weight, shape (Din, Dout), pre-cast to bf16)."""
    N, Din = x.shape
    Dout = w_bf16.shape[1]
    if tile_m is None:
        tile_m = min(N, 1024)         # large M tiles: amortize ~0.35us per-grid-step overhead
    grid_m = pl.cdiv(N, tile_m)
    return pl.pallas_call(
        partial(_linear_kernel, act=act),
        out_shape=jax.ShapeDtypeStruct((N, Dout), jnp.float32),
        grid=(grid_m,),
        in_specs=[pl.BlockSpec((tile_m, Din), lambda i: (i, 0)),
                  pl.BlockSpec((Din, Dout), lambda i: (0, 0)),
                  pl.BlockSpec((1, Dout), lambda i: (0, 0))],
        out_specs=pl.BlockSpec((tile_m, Dout), lambda i: (i, 0)),
        compiler_params=pltpu.CompilerParams(dimension_semantics=("parallel",),
                                             vmem_limit_bytes=VMEM_LIMIT),
    )(x, w_bf16, b.reshape(1, Dout))


# ----------------------------------------------------------------------------- fused TransformerEncoderLayer
def _encoder_layer_kernel(src_ref, gd_ref, in_wt_ref, in_b_ref, out_wt_ref, out_b_ref,
                          ln1_g_ref, ln1_b_ref, lin1_wt_ref, lin1_b_ref,
                          lin2_wt_ref, lin2_b_ref, ln2_g_ref, ln2_b_ref,
                          *rest, num_heads, eps, has_skip):
    if has_skip:
        skip_wt_ref, skip_b_ref, o_ref = rest
    else:
        (o_ref,) = rest

    # One batch element per grid step; src/guide concatenated in VMEM (no HBM concat round trip).
    src = src_ref[0]                               # (Ls, C) f32
    gd = gd_ref[0]                                 # (Lg, C) f32
    Ls, C = src.shape
    Dh = C // num_heads
    scale = 1.0 / math.sqrt(Dh)
    bf16 = jnp.bfloat16

    x = jnp.concatenate([src, gd], axis=0)         # (L, C) — sublane concat, stays in VMEM
    qkv = jnp.dot(x.astype(bf16), in_wt_ref[...],
                  preferred_element_type=jnp.float32) + in_b_ref[...]        # (L, 3C) f32
    qkvb = qkv.astype(bf16)                        # single cast; slices below feed the MXU directly

    # Per-head attention.  Only the src rows are queried (torch keeps [:, :Ls] after the layer).
    # Each head's output is folded straight into the out-projection accumulator so the working set
    # stays lane-dense (Ls, C) — no 8-way concat of 32-lane head tiles.
    attn = jnp.zeros((Ls, C), jnp.float32) + out_b_ref[...]
    for h in range(num_heads):                     # static -> unrolled
        qh = qkvb[:Ls, h * Dh:(h + 1) * Dh]                    # (Ls, Dh)
        kh = qkvb[:, C + h * Dh:C + (h + 1) * Dh]              # (L, Dh)
        vh = qkvb[:, 2 * C + h * Dh:2 * C + (h + 1) * Dh]      # (L, Dh)
        s = lax.dot_general(qh, kh, (((1,), (1,)), ((), ())),
                            preferred_element_type=jnp.float32) * scale      # (Ls, L)
        m = jnp.max(s, axis=-1, keepdims=True)
        p = jnp.exp(s - m)
        p = p * pl.reciprocal(jnp.sum(p, axis=-1, keepdims=True), approx=True)
        head = jnp.dot(p.astype(bf16), vh, preferred_element_type=jnp.float32)   # (Ls, Dh)
        attn = attn + jnp.dot(head.astype(bf16), out_wt_ref[h],
                              preferred_element_type=jnp.float32)                # (Ls, C)

    def ln(v, g, b):
        mu = jnp.mean(v, axis=-1, keepdims=True)
        vc = v - mu
        var = jnp.mean(vc * vc, axis=-1, keepdims=True)
        return vc * lax.rsqrt(var + eps) * g + b

    # post-norm (norm_first=False), ReLU FFN, dropout == identity (eval-mode semantics)
    h1 = ln(src + attn, ln1_g_ref[...], ln1_b_ref[...])                      # (Ls, C)
    ff = jnp.dot(h1.astype(bf16), lin1_wt_ref[...],
                 preferred_element_type=jnp.float32) + lin1_b_ref[...]
    ff = jnp.maximum(ff, 0.0)
    ff = jnp.dot(ff.astype(bf16), lin2_wt_ref[...],
                 preferred_element_type=jnp.float32) + lin2_b_ref[...]
    y = ln(h1 + ff, ln2_g_ref[...], ln2_b_ref[...])

    if has_skip:
        # fused skip Linear(residual) + residual add (residual == this layer's src input)
        y = y + jnp.dot(src.astype(bf16), skip_wt_ref[...],
                        preferred_element_type=jnp.float32) + skip_b_ref[...]

    o_ref[0] = y.astype(o_ref.dtype)


def transformer_encoder_layer(src_tok, guide_tok, p, num_heads, skip=None):
    # PyTorch TransformerEncoderLayer, batch_first=True, norm_first=False, activation=ReLU,
    # applied to concat([src, guide]) with only the src rows kept (and optional fused skip Linear).
    B, Ls, C = src_tok.shape
    _, Lg, _ = guide_tok.shape
    FF = p["lin1_wt"].shape[1]
    has_skip = skip is not None

    in_specs = [
        pl.BlockSpec((1, Ls, C), lambda b: (b, 0, 0)),
        pl.BlockSpec((1, Lg, C), lambda b: (b, 0, 0)),
        pl.BlockSpec((C, 3 * C), lambda b: (0, 0)),
        pl.BlockSpec((1, 3 * C), lambda b: (0, 0)),
        pl.BlockSpec((num_heads, C // num_heads, C), lambda b: (0, 0, 0)),
        pl.BlockSpec((1, C), lambda b: (0, 0)),
        pl.BlockSpec((1, C), lambda b: (0, 0)),
        pl.BlockSpec((1, C), lambda b: (0, 0)),
        pl.BlockSpec((C, FF), lambda b: (0, 0)),
        pl.BlockSpec((1, FF), lambda b: (0, 0)),
        pl.BlockSpec((FF, C), lambda b: (0, 0)),
        pl.BlockSpec((1, C), lambda b: (0, 0)),
        pl.BlockSpec((1, C), lambda b: (0, 0)),
        pl.BlockSpec((1, C), lambda b: (0, 0)),
    ]
    args = [src_tok, guide_tok,
            p["in_wt"], p["in_b"],
            p["out_wt_h"], p["out_b"],
            p["ln1_g"], p["ln1_b"],
            p["lin1_wt"], p["lin1_b"],
            p["lin2_wt"], p["lin2_b"],
            p["ln2_g"], p["ln2_b"]]
    if has_skip:
        in_specs += [pl.BlockSpec((C, C), lambda b: (0, 0)),
                     pl.BlockSpec((1, C), lambda b: (0, 0))]
        args += [skip["wt"], skip["b"]]

    # TODO(synk): for real 64x64 SAM maps (L>=4096) retile flash-style over KV blocks and L rows.
    return pl.pallas_call(
        partial(_encoder_layer_kernel, num_heads=num_heads, eps=1e-5, has_skip=has_skip),
        out_shape=jax.ShapeDtypeStruct((B, Ls, C), jnp.float32),
        grid=(B,),
        in_specs=in_specs,
        out_specs=pl.BlockSpec((1, Ls, C), lambda b: (b, 0, 0)),
        compiler_params=pltpu.CompilerParams(dimension_semantics=("parallel",),
                                             vmem_limit_bytes=VMEM_LIMIT),
    )(*args)


# ----------------------------------------------------------------------------- bilinear resize (glue)
def bilinear_resize_nchw(x, out_h, out_w):
    # plain-JAX glue for F.interpolate(mode='bilinear', align_corners=False)
    B, C, H, W = x.shape
    ys = jnp.maximum((jnp.arange(out_h, dtype=jnp.float32) + 0.5) * (H / out_h) - 0.5, 0.0)
    xs = jnp.maximum((jnp.arange(out_w, dtype=jnp.float32) + 0.5) * (W / out_w) - 0.5, 0.0)
    y0 = jnp.floor(ys).astype(jnp.int32)
    x0 = jnp.floor(xs).astype(jnp.int32)
    wy = (ys - y0.astype(jnp.float32))[:, None]
    wx = (xs - x0.astype(jnp.float32))[None, :]
    y1 = jnp.minimum(y0 + 1, H - 1)
    x1 = jnp.minimum(x0 + 1, W - 1)

    def g(yi, xi):
        return x[:, :, yi, :][:, :, :, xi]

    top = (1.0 - wx) * g(y0, x0) + wx * g(y0, x1)
    bot = (1.0 - wx) * g(y1, x0) + wx * g(y1, x1)
    return (1.0 - wy) * top + wy * bot


def multi_scale_cross_attention(src_nchw, guide_nchw, p):
    # layout: accepts PyTorch NCHW; tokens are (B, H*W, C) as in the torch module
    B, C, H, W = src_nchw.shape
    _, _, Hg, Wg = guide_nchw.shape
    src = src_nchw + bilinear_resize_nchw(guide_nchw, H, W)
    src_tok = src.reshape(B, C, H * W).transpose(0, 2, 1)          # (B, Ls, C)
    guide_tok = guide_nchw.reshape(B, C, Hg * Wg).transpose(0, 2, 1)  # (B, Lg, C)
    for i, lp in enumerate(p["layers"]):
        skip = p["skips"][i - 1] if i > 0 else None
        src_tok = transformer_encoder_layer(src_tok, guide_tok, lp, NUM_HEADS, skip=skip)
    return src_tok.transpose(0, 2, 1).reshape(B, C, H, W)


# ----------------------------------------------------------------------------- _LoRA_qkv (folded) kernel
def lora_qkv(x, lp, tile_m=None):
    # layout: x is (B, H, W, C) channels-last (SAM ViT block layout; _LoRA_qkv indexes
    # qkv[:, :, :, :dim]); flattened to (N, C).  The LoRA rank-4 adapters are folded into the dense
    # qkv weight at prep time (forward/inference-identical), so this is one full-K bf16 matmul per tile.
    B, H, W, C = x.shape
    out = pallas_linear(x.reshape(B * H * W, C), lp["w_eff"], lp["bqkv"], tile_m=tile_m)
    return out.reshape(B, H, W, 3 * C)


# ----------------------------------------------------------------------------- AdaptiveFeatureFusion kernel
def _fusion_kernel(img_ref, gd_ref, w1_ref, b1_ref, w2_ref, b2_ref, tsp_ref, bsp_ref, o_ref):
    # layout: one batch element per grid step, NHWC block (1, H, W, C); channels on lanes.
    # Kept in f32: these matmuls are tiny and the fusion output is numerically checked vs the ref.
    img = img_ref[0]          # (H, W, C)
    gd = gd_ref[0]
    H, W, C = img.shape

    # channel attention: AdaptiveAvgPool2d(1) -> 1x1 conv -> ReLU -> 1x1 conv -> Sigmoid
    s = img + gd
    pooled = jnp.mean(jnp.mean(s, axis=0), axis=0, keepdims=True)                     # (1, C)
    h = jnp.dot(pooled, w1_ref[...], preferred_element_type=jnp.float32) + b1_ref[...]
    h = jnp.maximum(h, 0.0)
    cw = _sigmoid(jnp.dot(h, w2_ref[...], preferred_element_type=jnp.float32) + b2_ref[...])  # (1, C)

    # spatial attention: 7x7 conv (padding 3) over [mean_c, max_c] -> sigmoid.
    # Implemented as 7 banded-matrix MXU matmuls (bands built at prep time) instead of 98
    # unaligned shifted-window slice+FMA passes.
    avg = jnp.mean(img, axis=2)                        # (H, W)
    mx = jnp.max(img, axis=2)                          # (H, W)

    def pad3(m):
        zc = jnp.zeros((H, 3), jnp.float32)
        m2 = jnp.concatenate([zc, m, zc], axis=1)      # (H, W+6)
        zr = jnp.zeros((3, W + 6), jnp.float32)
        return jnp.concatenate([zr, m2, zr], axis=0)   # (H+6, W+6)

    combined = jnp.concatenate([pad3(avg), pad3(mx)], axis=1)     # (H+6, 2*(W+6))
    acc = jnp.zeros((H, W), jnp.float32) + bsp_ref[0]
    for ky in range(7):                                            # static -> unrolled
        acc = acc + jnp.dot(combined[ky:ky + H, :], tsp_ref[ky],
                            preferred_element_type=jnp.float32)    # (H, W)
    sw = _sigmoid(acc)

    fused = cw.reshape(1, 1, C) * sw[:, :, None] * gd
    o_ref[0] = (img + fused).astype(o_ref.dtype)


def adaptive_feature_fusion(image_nchw, guide_nchw, p):
    # layout: wrapper takes PyTorch NCHW and transposes to NHWC for the kernel
    # TODO(synk): for real 64x64x256 maps tile the grid over H rows (3-row halo) to fit v5e's VMEM.
    B, C, H, W = image_nchw.shape
    img = jnp.transpose(image_nchw, (0, 2, 3, 1))
    gd = jnp.transpose(guide_nchw, (0, 2, 3, 1))
    Wb = p["tsp"].shape[1]
    out = pl.pallas_call(
        _fusion_kernel,
        out_shape=jax.ShapeDtypeStruct((B, H, W, C), jnp.float32),
        grid=(B,),
        in_specs=[pl.BlockSpec((1, H, W, C), lambda b: (b, 0, 0, 0)),
                  pl.BlockSpec((1, H, W, C), lambda b: (b, 0, 0, 0)),
                  pl.BlockSpec((C, C // 8), lambda b: (0, 0)),
                  pl.BlockSpec((1, C // 8), lambda b: (0, 0)),
                  pl.BlockSpec((C // 8, C), lambda b: (0, 0)),
                  pl.BlockSpec((1, C), lambda b: (0, 0)),
                  pl.BlockSpec((7, Wb, W), lambda b: (0, 0, 0)),
                  pl.BlockSpec(memory_space=pltpu.MemorySpace.SMEM)],
        out_specs=pl.BlockSpec((1, H, W, C), lambda b: (b, 0, 0, 0)),
        compiler_params=pltpu.CompilerParams(dimension_semantics=("parallel",),
                                             vmem_limit_bytes=VMEM_LIMIT),
    )(img, gd, p["w1t"], p["b1"], p["w2t"], p["b2"], p["tsp"], p["bsp"])
    return jnp.transpose(out, (0, 3, 1, 2))


# ----------------------------------------------------------------------------- LoRA_Sam guided path
@jax.jit
def lora_sam_guided_forward(image_embeddings, guide_matrix, cross_params, fusion_params):
    # In-file portion of LoRA_Sam.forward (guide_matrix is not None branch):
    #   attn_feat = self.cross_attn(image_embeddings, guide_matrix)
    #   enhanced  = self.feature_fusion(image_embeddings, attn_feat)
    #   image_embeddings = image_embeddings + 0.1 * enhanced
    attn_feat = multi_scale_cross_attention(image_embeddings, guide_matrix, cross_params)
    enhanced = adaptive_feature_fusion(image_embeddings, attn_feat, fusion_params)
    return image_embeddings + 0.1 * enhanced, attn_feat, enhanced


# ----------------------------------------------------------------------------- raw parameter init
def init_params(key):
    ks = iter(jax.random.split(key, 64))

    def w(shape, scale=0.02):
        return scale * jax.random.normal(next(ks), shape, jnp.float32)

    C, FF = EMBED_DIM, FF_DIM
    layers = []
    for _ in range(2):
        layers.append(dict(
            in_wt=w((C, 3 * C)), in_b=jnp.zeros((3 * C,), jnp.float32),
            out_wt=w((C, C)), out_b=jnp.zeros((C,), jnp.float32),
            ln1_g=jnp.ones((C,), jnp.float32), ln1_b=jnp.zeros((C,), jnp.float32),
            lin1_wt=w((C, FF)), lin1_b=jnp.zeros((FF,), jnp.float32),
            lin2_wt=w((FF, C)), lin2_b=jnp.zeros((C,), jnp.float32),
            ln2_g=jnp.ones((C,), jnp.float32), ln2_b=jnp.zeros((C,), jnp.float32)))
    skips = [dict(wt=w((C, C)), b=jnp.zeros((C,), jnp.float32))]
    cross = dict(layers=layers, skips=skips)

    fusion = dict(
        w1t=w((C, C // 8)), b1=jnp.zeros((C // 8,), jnp.float32),
        w2t=w((C // 8, C)), b2=jnp.zeros((C,), jnp.float32),
        wsp=w((2 * 7 * 7,), scale=0.05), bsp=jnp.zeros((1,), jnp.float32))

    D, R = LORA_DIM, LORA_R
    bound = 1.0 / math.sqrt(D)      # kaiming_uniform(a=sqrt(5)) bound
    # note: reset_parameters zero-inits the B matrices; nonzero values are used here so that
    #       the LoRA-add path is actually exercised by the numerical check below.
    lora = dict(
        wqkv_t=w((D, 3 * D)), bqkv=jnp.zeros((3 * D,), jnp.float32),
        aq_t=jax.random.uniform(next(ks), (D, R), jnp.float32, -bound, bound),
        bq_t=w((R, D)),
        av_t=jax.random.uniform(next(ks), (D, R), jnp.float32, -bound, bound),
        bv_t=w((R, D)))

    return dict(cross_attn=cross, fusion=fusion, lora=lora)


# ----------------------------------------------------------------------------- parameter prep (done once)
def prepare_cross_params(cross):
    # Pre-cast matmul weights to bf16, reshape biases/LN params to (1, D), and split the out-proj
    # weight per head -> (num_heads, Dh, C) so the kernel indexes it on the leading axis.
    bf16 = jnp.bfloat16
    C = EMBED_DIM
    layers = []
    for lp in cross["layers"]:
        layers.append(dict(
            in_wt=lp["in_wt"].astype(bf16), in_b=lp["in_b"].reshape(1, -1),
            out_wt_h=lp["out_wt"].reshape(NUM_HEADS, C // NUM_HEADS, C).astype(bf16),
            out_b=lp["out_b"].reshape(1, -1),
            ln1_g=lp["ln1_g"].reshape(1, -1), ln1_b=lp["ln1_b"].reshape(1, -1),
            lin1_wt=lp["lin1_wt"].astype(bf16), lin1_b=lp["lin1_b"].reshape(1, -1),
            lin2_wt=lp["lin2_wt"].astype(bf16), lin2_b=lp["lin2_b"].reshape(1, -1),
            ln2_g=lp["ln2_g"].reshape(1, -1), ln2_b=lp["ln2_b"].reshape(1, -1)))
    skips = [dict(wt=s["wt"].astype(bf16), b=s["b"].reshape(1, -1)) for s in cross["skips"]]
    return dict(layers=layers, skips=skips)


def _build_spatial_bands(wsp, W):
    # Banded matrices for the 7x7 cross-correlation:  out[y,x] = sum_{c,ky,col} padded_c[y+ky,col] *
    # T[ky, c*(W+6)+col, x]  with  T[...] = w[c,ky,col-x]  for col-x in [0,7).
    w = wsp.reshape(2, 7, 7)
    col = jnp.arange(W + 6)[:, None]
    xs = jnp.arange(W)[None, :]
    kx = col - xs                                  # (W+6, W)
    valid = (kx >= 0) & (kx < 7)
    kxc = jnp.clip(kx, 0, 6)
    bands = []
    for ky in range(7):
        blocks = [jnp.where(valid, w[c, ky][kxc], 0.0) for c in range(2)]
        bands.append(jnp.concatenate(blocks, axis=0))   # (2*(W+6), W)
    return jnp.stack(bands, axis=0)                      # (7, 2*(W+6), W)


def prepare_fusion_params(fusion, W):
    return dict(w1t=fusion["w1t"], b1=fusion["b1"].reshape(1, -1),
                w2t=fusion["w2t"], b2=fusion["b2"].reshape(1, -1),
                tsp=_build_spatial_bands(fusion["wsp"], W),
                bsp=fusion["bsp"])


def prepare_lora_params(lora):
    # Fold the rank-R LoRA adapters into the dense qkv weight once (mathematically identical for
    # forward/inference); the factored A/B weights remain available in the raw param dict for training.
    C = lora["wqkv_t"].shape[0]
    R = lora["aq_t"].shape[1]
    a_cat = jnp.concatenate([lora["aq_t"], lora["av_t"]], axis=1)                 # (C, 2R)
    b_cat = jnp.zeros((2 * R, 3 * C), jnp.float32)
    b_cat = b_cat.at[:R, :C].set(lora["bq_t"]).at[R:, 2 * C:].set(lora["bv_t"])   # (2R, 3C)
    w_eff = lora["wqkv_t"] + a_cat @ b_cat                                        # f32 fold, then bf16
    return dict(w_eff=w_eff.astype(jnp.bfloat16), bqkv=lora["bqkv"])


# ----------------------------------------------------------------------------- plain-JAX references
def fusion_ref(img, gd, p):
    pooled = jnp.mean(img + gd, axis=(2, 3))
    h = jnp.maximum(pooled @ p["w1t"] + p["b1"], 0.0)
    cw = jax.nn.sigmoid(h @ p["w2t"] + p["b2"])
    avg = jnp.mean(img, axis=1, keepdims=True)
    mx = jnp.max(img, axis=1, keepdims=True)
    inp = jnp.concatenate([avg, mx], axis=1)
    wk = p["wsp"].reshape(1, 2, 7, 7)
    sw = lax.conv_general_dilated(inp, wk, (1, 1), ((3, 3), (3, 3)),
                                  dimension_numbers=("NCHW", "OIHW", "NCHW"))
    sw = jax.nn.sigmoid(sw + p["bsp"].reshape(1, 1, 1, 1))
    return img + cw[:, :, None, None] * sw * gd


if __name__ == "__main__":
    key = jax.random.PRNGKey(0)
    kp, kx, ki, kg = jax.random.split(key, 4)
    raw = init_params(kp)

    # 1) LoRA-adapted qkv (_LoRA_qkv) — replaces blk.attn.qkv inside the frozen image encoder
    lora_prep = prepare_lora_params(raw["lora"])
    x_tok = jax.random.normal(kx, (2, 4, 4, LORA_DIM), jnp.float32)
    qkv = lora_qkv(x_tok, lora_prep)

    x2 = x_tok.reshape(-1, LORA_DIM)
    lo = raw["lora"]
    ref = x2 @ lo["wqkv_t"] + lo["bqkv"]
    dq = (x2 @ lo["aq_t"]) @ lo["bq_t"]
    dv = (x2 @ lo["av_t"]) @ lo["bv_t"]
    ref = ref.at[:, :LORA_DIM].add(dq).at[:, -LORA_DIM:].add(dv).reshape(2, 4, 4, 3 * LORA_DIM)
    # tolerance covers bf16 MXU operands (f32 accumulation) vs the f32 reference
    assert bool(jnp.allclose(qkv, ref, atol=3e-3, rtol=3e-3))

    # 2) Guided-enhancement path of LoRA_Sam.forward
    image_embeddings = jax.random.normal(ki, (2, EMBED_DIM, 8, 8), jnp.float32)
    guide_matrix = jax.random.normal(kg, (2, EMBED_DIM, 4, 4), jnp.float32)
    cross_prep = prepare_cross_params(raw["cross_attn"])
    fusion_prep = prepare_fusion_params(raw["fusion"], W=image_embeddings.shape[3])

    enhanced_embeddings, attn_feat, enhanced = lora_sam_guided_forward(
        image_embeddings, guide_matrix, cross_prep, fusion_prep)

    ref_enh = fusion_ref(image_embeddings, attn_feat, raw["fusion"])
    assert bool(jnp.allclose(enhanced, ref_enh, atol=2e-3, rtol=2e-3))

    jax.block_until_ready((qkv, enhanced_embeddings, attn_feat, enhanced))
    print("KERNEL_OK")
</pallas_src>

<mosaic_0001>
module attributes {stable_mosaic.version = 11 : i64} {
  func.func @_linear_kernel(%arg0: i32, %arg1: memref<32x64xf32, #tpu.memory_space<vmem>>, %arg2: memref<64x192xbf16, #tpu.memory_space<vmem>>, %arg3: memref<1x192xf32, #tpu.memory_space<vmem>>, %arg4: memref<32x192xf32, #tpu.memory_space<vmem>>) attributes {dimension_semantics = [#tpu.dimension_semantics<parallel>], iteration_bounds = array<i64: 1>, scalar_prefetch = 0 : i64, scratch_operands = 0 : i64, tpu.core_type = #tpu.core_type<tc>, window_params = [{transform_indices = @transform_0, window_bounds = array<i64: 32, 64>}, {pipeline_mode = #tpu.pipeline_mode<synchronous>, transform_indices = @transform_1, window_bounds = array<i64: 64, 192>}, {pipeline_mode = #tpu.pipeline_mode<synchronous>, transform_indices = @transform_2, window_bounds = array<i64: 1, 192>}, {transform_indices = @transform_3, window_bounds = array<i64: 32, 192>}]} {
    %c0 = arith.constant 0 : index
    %c0_0 = arith.constant 0 : index
    %0 = vector.load %arg1[%c0, %c0_0] : memref<32x64xf32, #tpu.memory_space<vmem>>, vector<32x64xf32>
    %1 = arith.truncf %0 : vector<32x64xf32> to vector<32x64xbf16>
    %c0_1 = arith.constant 0 : index
    %c0_2 = arith.constant 0 : index
    %2 = vector.load %arg2[%c0_1, %c0_2] : memref<64x192xbf16, #tpu.memory_space<vmem>>, vector<64x192xbf16>
    %cst = arith.constant dense<0.000000e+00> : vector<32x192xf32>
    %3 = tpu.matmul %1, %2, %cst {dimension_numbers = #tpu.dot_dimension_numbers<[1], [0], [0], [1], [0, 0, 1, 1], [], []>} : vector<32x64xbf16>, vector<64x192xbf16>, vector<32x192xf32> -> vector<32x192xf32>
    %c0_3 = arith.constant 0 : index
    %c0_4 = arith.constant 0 : index
    %4 = vector.load %arg3[%c0_3, %c0_4] : memref<1x192xf32, #tpu.memory_space<vmem>>, vector<1x192xf32>
    %5 = vector.broadcast %4 : vector<1x192xf32> to vector<32x192xf32>
    %6 = arith.addf %3, %5 : vector<32x192xf32>
    %c0_5 = arith.constant 0 : index
    %c0_6 = arith.constant 0 : index
    %7 = vector.load %arg4[%c0_5, %c0_6] : memref<32x192xf32, #tpu.memory_space<vmem>>, vector<32x192xf32>
    tpu.vector_store %arg4[%c0_5, %c0_6], %6 {strides = array<i32>} : memref<32x192xf32, #tpu.memory_space<vmem>>, vector<32x192xf32>,
    return
  }
  func.func @transform_0(%arg0: i32) -> (i32, i32) {
    %c0_i32 = arith.constant 0 : i32
    %c0_i32_0 = arith.constant 0 : i32
    return %arg0, %c0_i32 : i32, i32
  }
  func.func @transform_1(%arg0: i32) -> (i32, i32) {
    %c0_i32 = arith.constant 0 : i32
    %c0_i32_0 = arith.constant 0 : i32
    %c0_i32_1 = arith.constant 0 : i32
    return %c0_i32, %c0_i32_0 : i32, i32
  }
  func.func @transform_2(%arg0: i32) -> (i32, i32) {
    %c0_i32 = arith.constant 0 : i32
    %c0_i32_0 = arith.constant 0 : i32
    %c0_i32_1 = arith.constant 0 : i32
    return %c0_i32, %c0_i32_0 : i32, i32
  }
  func.func @transform_3(%arg0: i32) -> (i32, i32) {
    %c0_i32 = arith.constant 0 : i32
    %c0_i32_0 = arith.constant 0 : i32
    return %arg0, %c0_i32 : i32, i32
  }
}

</mosaic_0001>

<bundles_post_ra>
// kernel: tpu_custom_call.1
= control target key start
LH: loop header
LB: loop body
LE: loop exit
PB: predicated region body
PF: predicated region fallthrough
CT: control target
= control target key end

     0   :  { %8 = vsyncpa [#allocation3], 0  ;;  %s379_s0 = inlined_call_operand.hbm [shape: f32[32,64], index: 0, kind: input, shape index: {}]   ;;  %s380_s1 = inlined_call_operand.hbm [shape: bf16[64,192], index: 1, kind: input, shape index: {}]   ;;  %s381_s2 = inlined_call_operand.vmem [shape: f32[1,192], index: 2, kind: input, shape index: {}]   ;;  %s382_s3 = inlined_call_operand.hbm [shape: f32[32,192], index: 3, kind: output, shape index: {}]  }
   0x1   :  { %9 = vsyncpa [#allocation6], 0 }
   0x2   :  { %10 = vsyncpa [#allocation4], 0  ;;  %s306_s12 = smov [#allocation2]   ;;  %s234_s16 = scalar_lea.hbm %s379_s0, 512 }
   0x3   :  { %s16_s13 = sshll.u32 %s306_s12, 4  ;;  %p235_p0 = scmp.ne.s32.totalorder %s379_s0, %s234_s16  ;;  %s17_s13 = int_to_ptr.vmem [resolvable:$true] %s16_s13 }
   0x4   :  { %p238_p1 = scmp.lt.u32.totalorder %s234_s16, %s379_s0 }
   0x6   :  { %p240_p2 = pnand %p238_p1, %p235_p0 }
   0x8   :  { %243 = shalt.err (!%p240_p2)
}
   0x9   :  { %s244_s21 = scalar_lea.vmem %s17_s13, 512  ;;  %p249_p4 = scmp.lt.s32.totalorder %s17_s13, %s17_s13 }
   0xa   :  { %p245_p3 = scmp.ne.s32.totalorder %s17_s13, %s244_s21  ;;  %p250_p5 = scmp.lt.s32.totalorder %s244_s21, %s244_s21 }
   0xc   :  { %p251_p6 = por %p250_p5, %p249_p4 }
   0xe   :  { %p252_p7 = pnand %p251_p6, %p245_p3 }
  0x10   :  { %255 = shalt.err (!%p252_p7)
}
  0x11   :  { %s307_s22 = smov 128   ;;  %s308_s23 = smov 8  }
  0x12   :  { %22 = dma.hbm_to_vmem [thread:$0]  %s379_s0, 512, %s17_s13, [#allocation3], %s307_s22, %s307_s22, %s308_s23  }
  0x13   :  { %s309_s26 = smov [#allocation5]   ;;  %s256_s30 = scalar_lea.hbm %s380_s1, 1024 }
  0x14   :  { %s28_s27 = sshll.u32 %s309_s26, 4  ;;  %p257_p8 = scmp.ne.s32.totalorder %s380_s1, %s256_s30  ;;  %s29_s27 = int_to_ptr.vmem [resolvable:$true] %s28_s27 }
  0x15   :  { %p260_p9 = scmp.lt.u32.totalorder %s256_s30, %s380_s1 }
  0x17   :  { %p262_p10 = pnand %p260_p9, %p257_p8 }
  0x19   :  { %265 = shalt.err (!%p262_p10)
}
  0x1a   :  { %s266_s8 = scalar_lea.vmem %s29_s27, 1024  ;;  %p271_p12 = scmp.lt.s32.totalorder %s29_s27, %s29_s27 }
  0x1b   :  { %p267_p11 = scmp.ne.s32.totalorder %s29_s27, %s266_s8  ;;  %p272_p13 = scmp.lt.s32.totalorder %s266_s8, %s266_s8 }
  0x1d   :  { %p273_p0 = por %p272_p13, %p271_p12 }
  0x1f   :  { %p274_p1 = pnand %p273_p0, %p267_p11 }
  0x21   :  { %277 = shalt.err (!%p274_p1)
}
  0x22   :  { %34 = dma.hbm_to_vmem [thread:$0]  %s380_s1, 1024, %s29_s27, [#allocation6], %s307_s22, %s307_s22, %s308_s23  }
  0x23   :  { %300 = dma.done.wait [#allocation3], 512  }
  0x24   :  { %301 = vsyncadd [#allocation3], 4294966784 }
  0x25   :  { %302 = dma.done.wait [#allocation6], 1024  }
  0x26   :  { %303 = vsyncadd [#allocation6], 4294966272  ;;  %v310_v0 = vmov 0   ;;  %v222_v1 = vld [vmem:[#allocation5 + $0x4] ss:$8 sps:$4 sm:$0xff]   ;;  %v46_v11 = vld [vmem:[#allocation2 + $0x10] sm:$0xff]  ;;  %v60_v15 = vlaneseq }
  0x27   :  { %149 = vmatprep.mubr.bf16.mxu0 %v310_v0  ;;  %159 = vmatprep.mubr.bf16.mxu1 %v310_v0  ;;  %v224_v2 = vld [vmem:[#allocation5] ss:$8 sps:$4 sm:$0xff]   ;;  %v225_v3 = vld [vmem:[#allocation5 + $0x14] ss:$8 sps:$4 sm:$0xff]   ;;  %v227_v4 = vld [vmem:[#allocation5 + $0x10] ss:$8 sps:$4 sm:$0xff]  }
  0x28   :  { %117 = vmatprep.subr.bf16.mxu0 %v222_v1  ;;  %206 = vmatprep.subr.bf16.mxu1 %v222_v1  ;;  %v228_v5 = vld [vmem:[#allocation5 + $0x24] ss:$8 sps:$4 sm:$0xff]   ;;  %v230_v6 = vld [vmem:[#allocation5 + $0x20] ss:$8 sps:$4 sm:$0xff]   ;;  %v231_v7 = vld [vmem:[#allocation5 + $0x34] ss:$8 sps:$4 sm:$0xff]  }
  0x29   :  { %118 = vmatpush1.bf16.msra.mxu0 %v224_v2  ;;  %210 = vmatpush1.bf16.msra.mxu1 %v224_v2  ;;  %v233_v8 = vld [vmem:[#allocation5 + $0x30] ss:$8 sps:$4 sm:$0xff]   ;;  %v44_v9 = vld [vmem:[#allocation2] sm:$0xff]  ;;  %v45_v10 = vld [vmem:[#allocation2 + $0x8] sm:$0xff]  ;;  %vm110_vm0 = vcmask 523264   ;;  %v61_v16 = vshrl.u32 %v60_v15, 7 }
  0x2a   :  { %119 = vmatprep.subr.bf16.mxu0 %v225_v3  ;;  %207 = vmatprep.subr.bf16.mxu1 %v225_v3  ;;  %v47_v12 = vld [vmem:[#allocation2 + $0x18] sm:$0xff]  ;;  %v48_v13 = vpack.c.bf16 %v45_v10, %v44_v9  ;;  %v58_v18 = vld [vmem:[%s381_s2] sm:$0x3]  ;;  %s311_s11 = smov [#allocation7]  }
  0x2b   :  { %v49_v14 = vpack.c.bf16 %v47_v12, %v46_v11  ;;  %v62_v17 = vsub.s32 0, %v61_v16  ;;  %v66_v19 = vsub.s32 1, %v61_v16  ;;  %s183_s12 = sshll.u32 %s311_s11, 4  ;;  %s184_s12 = int_to_ptr.vmem [resolvable:$true] %s183_s12 }
  0x2c   :  { %s278_s2 = scalar_lea.vmem %s184_s12, 1024  ;;  %p283_p3 = scmp.lt.s32.totalorder %s184_s12, %s184_s12 }
  0x2d   :  { %120 = vmatpush1.bf16.msra.mxu0 %v227_v4  ;;  %211 = vmatpush1.bf16.msra.mxu1 %v227_v4  ;;  %v63_v20 = vrot.slane %v58_v18, %v62_v17  ;;  %v67_v21 = vrot.slane %v58_v18, %v66_v19  ;;  %p279_p2 = scmp.ne.s32.totalorder %s184_s12, %s278_s2  ;;  %p284_p4 = scmp.lt.s32.totalorder %s278_s2, %s278_s2 }
  0x2e   :  { %121 = vmatprep.subr.bf16.mxu0 %v228_v5  ;;  %208 = vmatprep.subr.bf16.mxu1 %v228_v5 }
  0x2f   :  { %p285_p5 = por %p284_p4, %p283_p3 }
  0x31   :  { %122 = vmatpush1.bf16.msra.mxu0 %v230_v6  ;;  %212 = vmatpush1.bf16.msra.mxu1 %v230_v6  ;;  %p286_p6 = pnand %p285_p5, %p279_p2 }
  0x32   :  { %123 = vmatprep.subr.bf16.mxu0 %v231_v7  ;;  %209 = vmatprep.subr.bf16.mxu1 %v231_v7 }
  0x35   :  { %124 = vmatpush1.bf16.msra.mxu0 %v233_v8  ;;  %213 = vmatpush1.bf16.msra.mxu1 %v233_v8 }
  0x38   :  { %204 = vmatmul.mubr.msk.bf16.vlgmr.msra.gmra.mrb[0].mxu0 %vm110_vm0, %v48_v13  ;;  %205 = vmatmul.mubr.msk.bf16.vlgmr.msra.gmra.mrb[0].mxu1 %vm110_vm0, %v49_v14 }
 0x10b   :  { %v151_v22 = vpop.f32.mrb[0].mxu0  ;;  %v161_v23 = vpop.f32.mrb[0].mxu1 }
 0x10c   :  { %v152_v24 = vadd.f32 %v151_v22, %v63_v20  ;;  %v162_v25 = vadd.f32 %v161_v23, %v63_v20  ;;  %v153_v26 = vpop.f32.mrb[1].mxu0  ;;  %v163_v27 = vpop.f32.mrb[1].mxu1 }
 0x10d   :  { %v154_v28 = vadd.f32 %v153_v26, %v67_v21  ;;  %v164_v29 = vadd.f32 %v163_v27, %v67_v21  ;;  %v155_v30 = vpop.f32.mrb[2].mxu0  ;;  %v165_v31 = vpop.f32.mrb[2].mxu1 }
 0x10e   :  { %170 = vst [vmem:[#allocation7] sm:$0xff] %v152_v24  ;;  %174 = vst [vmem:[#allocation7 + $0x20] sm:$0xff] %v162_v25  ;;  %v156_v32 = vadd.f32 %v155_v30, %v63_v20  ;;  %v166_v33 = vadd.f32 %v165_v31, %v63_v20  ;;  %v157_v34 = vpop.f32.mrb[3].mxu0  ;;  %v167_v35 = vpop.f32.mrb[3].mxu1 }
 0x10f   :  { %171 = vst.msk [vmem:[#allocation7 + $0x8] sm:$0xff] %vm110_vm0, %v154_v28  ;;  %175 = vst.msk [vmem:[#allocation7 + $0x28] sm:$0xff] %vm110_vm0, %v164_v29  ;;  %v158_v36 = vadd.f32 %v157_v34, %v67_v21  ;;  %v168_v37 = vadd.f32 %v167_v35, %v67_v21 }
 0x110   :  { %172 = vst [vmem:[#allocation7 + $0x10] sm:$0xff] %v156_v32  ;;  %176 = vst [vmem:[#allocation7 + $0x30] sm:$0xff] %v166_v33 }
 0x111   :  { %173 = vst.msk [vmem:[#allocation7 + $0x18] sm:$0xff] %vm110_vm0, %v158_v36  ;;  %177 = vst.msk [vmem:[#allocation7 + $0x38] sm:$0xff] %vm110_vm0, %v168_v37 }
 0x112   :  { %289 = shalt.err (!%p286_p6)
}
 0x113   :  { %s290_s15 = scalar_lea.hbm %s382_s3, 1024 }
 0x114   :  { %p291_p7 = scmp.ne.s32.totalorder %s382_s3, %s290_s15  ;;  %p294_p8 = scmp.lt.u32.totalorder %s290_s15, %s382_s3 }
 0x116   :  { %p296_p9 = pnand %p294_p8, %p291_p7 }
 0x118   :  { %299 = shalt.err (!%p296_p9)
}
 0x119   :  { %s312_s20 = smov 256   ;;  %s313_s21 = smov 16  }
 0x11a   :  { %189 = dma.vmem_to_hbm [thread:$0]  %s184_s12, 1024, %s382_s3, [#allocation4], %s312_s20, %s312_s20, %s313_s21  }
 0x11b   :  { %304 = dma.done.wait [#allocation4], 1024  }
 0x11c   :  { %305 = vsyncadd [#allocation4], 4294966272 }
 0x11d   :  { %193 = vsyncpa [#allocation3], 1 }
 0x11e   :  { %194 = vsyncpa [#allocation6], 1 }
 0x11f   :  { %195 = vsyncpa [#allocation4], 1 }

</bundles_post_ra>
